<compile_context>
chip_gen: v7x
topology: tpu7x:2x2x1
jax: 0.10.0
libtpu: 0.0.40
codegen_flags: <defaults>
</compile_context>

<pallas_src>
import functools

import jax
import jax.numpy as jnp
from jax import lax
from jax.experimental import pallas as pl
from jax.experimental.pallas import tpu as pltpu

SMOOTH_NUM = 1e-5
SMOOTH_DEN = 1e-5


def _dice_ce_kernel(pred_ref, lab_ref, out_ref,
                    inter_acc, g_acc, p_acc, ce_acc,
                    *, batch, num_classes, spatial, rows, n_s_tiles):
    s = pl.program_id(1)

    # --- reset accumulators at the first spatial tile of each batch element ---
    @pl.when(s == 0)
    def _init():
        inter_acc[...] = jnp.zeros_like(inter_acc)
        g_acc[...] = jnp.zeros_like(g_acc)
        p_acc[...] = jnp.zeros_like(p_acc)
        ce_acc[...] = jnp.zeros_like(ce_acc)

    labels = lab_ref[0]                                   # (rows, 128) int32

    # --- validity mask only when the spatial extent was padded (static check) ---
    tile_pixels = rows * 128
    if n_s_tiles * tile_pixels != spatial:
        row_i = lax.broadcasted_iota(jnp.int32, (rows, 128), 0)
        lane_i = lax.broadcasted_iota(jnp.int32, (rows, 128), 1)
        gidx = s * tile_pixels + row_i * 128 + lane_i
        vmask = (gidx < spatial).astype(jnp.float32)
    else:
        vmask = None

    # --- channel-plane softmax pieces (unrolled over classes: pure VALU/EUP) ---
    planes = [pred_ref[0, c].astype(jnp.float32) for c in range(num_classes)]
    m = planes[0]
    for c in range(1, num_classes):
        m = jnp.maximum(m, planes[c])

    es = []
    onehots = []
    true_logit = jnp.zeros((rows, 128), jnp.float32)
    for c in range(num_classes):
        oh = (labels == c).astype(jnp.float32)
        if vmask is not None:
            oh = oh * vmask
        onehots.append(oh)
        true_logit = true_logit + oh * planes[c]
        es.append(jnp.exp(planes[c] - m))

    se = es[0]
    for c in range(1, num_classes):
        se = se + es[c]
    inv_se = pl.reciprocal(se, approx=False)              # EUP; exact parity w/ e/se

    # --- dice stats: elementwise accumulation, cross-lane reduce deferred ---
    for c in range(num_classes):
        prob_c = es[c] * inv_se
        if vmask is not None:
            prob_c = prob_c * vmask
        oh = onehots[c]
        inter_acc[c] = inter_acc[c] + oh * prob_c
        g_acc[c] = g_acc[c] + oh
        p_acc[c] = p_acc[c] + prob_c

    # --- cross-entropy accumulation (vectorized; masked where padded) ---
    lse = m + jnp.log(se)
    if vmask is not None:
        lse = lse * vmask
    ce_acc[...] = ce_acc[...] + (lse - true_logit)

    # --- finalize once per batch element: XLU reduces + dice ratio + normalize ---
    @pl.when(s == n_s_tiles - 1)
    def _finalize():
        dice_sum = jnp.float32(0.0)
        for c in range(num_classes):
            inter_c = jnp.sum(inter_acc[c])
            g_c = jnp.sum(g_acc[c])
            p_c = jnp.sum(p_acc[c])
            f_c = 1.0 - (2.0 * inter_c + SMOOTH_NUM) / (g_c + p_c + SMOOTH_DEN)
            dice_sum = dice_sum + f_c
        ce_b = jnp.sum(ce_acc[...])
        contrib = (dice_sum / float(num_classes * batch)
                   + ce_b / float(batch * spatial))
        out_ref[...] = jnp.full((1, 1, 128), contrib, dtype=jnp.float32)


def dice_ce_loss(y_pred, y_true, *, tile_rows=16, input_dtype=None):
    """y_pred: (B, N, H, W) float logits; y_true: (B, 1, H, W) class indices.

    tile_rows: sublane rows (of 128 pixels each) per spatial tile; must be a
               multiple of 8. Reduce for very large N to limit vreg pressure.
    input_dtype: optional cast of the logits stream (e.g. jnp.bfloat16) to halve
                 HBM traffic on mem-bound parts; compute stays f32 in-kernel.
    """
    B, N, H, W = y_pred.shape
    S = H * W
    assert tile_rows % 8 == 0

    n_rows = -(-S // 128)                      # total 128-lane rows of pixels
    if n_rows <= tile_rows:
        rows, n_s_tiles = n_rows, 1
    else:
        rows = tile_rows
        n_s_tiles = -(-n_rows // rows)
    rows_pad = rows * n_s_tiles
    s_pad = rows_pad * 128

    pred = y_pred
    if input_dtype is not None:
        pred = pred.astype(input_dtype)
    pred = pred.reshape(B, N, S)
    labels = y_true[:, 0].astype(jnp.int32).reshape(B, S)
    if s_pad != S:
        pred = jnp.pad(pred, ((0, 0), (0, 0), (0, s_pad - S)))
        labels = jnp.pad(labels, ((0, 0), (0, s_pad - S)))
    pred = pred.reshape(B, N, rows_pad, 128)     # channel-plane layout
    labels = labels.reshape(B, rows_pad, 128)    # sublane/lane-dense labels

    kernel = functools.partial(
        _dice_ce_kernel, batch=B, num_classes=N, spatial=S,
        rows=rows, n_s_tiles=n_s_tiles)

    partial_out = pl.pallas_call(
        kernel,
        out_shape=jax.ShapeDtypeStruct((B, 1, 128), jnp.float32),
        grid_spec=pltpu.PrefetchScalarGridSpec(
            num_scalar_prefetch=0,
            grid=(B, n_s_tiles),
            in_specs=[
                pl.BlockSpec((1, N, rows, 128), lambda b, s: (b, 0, s, 0)),
                pl.BlockSpec((1, rows, 128), lambda b, s: (b, s, 0)),
            ],
            out_specs=pl.BlockSpec((1, 1, 128), lambda b, s: (b, 0, 0)),
            scratch_shapes=[
                pltpu.VMEM((N, rows, 128), jnp.float32),   # intersection
                pltpu.VMEM((N, rows, 128), jnp.float32),   # ground_o
                pltpu.VMEM((N, rows, 128), jnp.float32),   # pred_o
                pltpu.VMEM((rows, 128), jnp.float32),      # cross-entropy
            ],
        ),
        compiler_params=pltpu.CompilerParams(
            dimension_semantics=("parallel", "arbitrary")),
    )(pred, labels)

    return jnp.sum(partial_out[:, 0, 0])


def _reference_loss(y_pred, y_true):
    """Plain-JAX reference (mirrors PyTorch DiceCELoss default config)."""
    B, N, H, W = y_pred.shape
    logits = y_pred.astype(jnp.float32)
    labels = y_true[:, 0].astype(jnp.int32)                     # (B, H, W)
    p = jax.nn.softmax(logits, axis=1)                          # (B, N, H, W)
    onehot = jax.nn.one_hot(labels, N, axis=1, dtype=jnp.float32)
    reduce_axis = (2, 3)
    inter = jnp.sum(onehot * p, axis=reduce_axis)
    g_o = jnp.sum(onehot, axis=reduce_axis)
    p_o = jnp.sum(p, axis=reduce_axis)
    f = 1.0 - (2.0 * inter + SMOOTH_NUM) / (g_o + p_o + SMOOTH_DEN)
    dice = jnp.mean(f)
    logp = jax.nn.log_softmax(logits, axis=1)
    ce = -jnp.mean(jnp.sum(onehot * logp, axis=1))
    return dice + ce


if __name__ == "__main__":
    key = jax.random.PRNGKey(0)

    def run_case(B, N, H, W, case_key):
        k1, k2 = jax.random.split(case_key)
        y_pred = jax.random.normal(k1, (B, N, H, W), dtype=jnp.float32)
        # ground-truth label map stored as float (matches torch .long() cast in module)
        y_true = jax.random.randint(k2, (B, 1, H, W), 0, N).astype(jnp.float32)
        loss = jax.block_until_ready(dice_ce_loss(y_pred, y_true))
        ref = jax.block_until_ready(_reference_loss(y_pred, y_true))
        assert jnp.allclose(loss, ref, rtol=1e-5, atol=1e-5), (loss, ref, (B, N, H, W))

    k0, k1, k2 = jax.random.split(key, 3)
    run_case(2, 4, 16, 16, k0)    # primary small case
    run_case(2, 3, 20, 20, k1)    # padded-spatial (masked tail) path
    run_case(1, 4, 64, 64, k2)    # multi-spatial-tile accumulation path
    print("KERNEL_OK")
</pallas_src>

<mosaic_0001>
module attributes {stable_mosaic.version = 11 : i64} {
  func.func @_dice_ce_kernel(%arg0: i32, %arg1: i32, %arg2: memref<1x4x2x128xf32, #tpu.memory_space<vmem>>, %arg3: memref<1x2x128xi32, #tpu.memory_space<vmem>>, %arg4: memref<1x1x128xf32, #tpu.memory_space<vmem>>, %arg5: memref<4x2x128xf32, #tpu.memory_space<vmem>>, %arg6: memref<4x2x128xf32, #tpu.memory_space<vmem>>, %arg7: memref<4x2x128xf32, #tpu.memory_space<vmem>>, %arg8: memref<2x128xf32, #tpu.memory_space<vmem>>) attributes {dimension_semantics = [#tpu.dimension_semantics<parallel>, #tpu.dimension_semantics<arbitrary>], iteration_bounds = array<i64: 2, 1>, scalar_prefetch = 0 : i64, scratch_operands = 4 : i64, tpu.core_type = #tpu.core_type<tc>, window_params = [{transform_indices = @transform_0, window_bounds = array<i64: 1, 4, 2, 128>}, {transform_indices = @transform_1, window_bounds = array<i64: 1, 2, 128>}, {transform_indices = @transform_2, window_bounds = array<i64: 1, 1, 128>}]} {
    %c0_i32 = arith.constant 0 : i32
    %0 = arith.cmpi eq, %arg1, %c0_i32 : i32
    %1 = arith.extui %0 : i1 to i32
    %c0_i32_0 = arith.constant 0 : i32
    %2 = arith.cmpi ne, %1, %c0_i32_0 : i32
    scf.if %2 {
      %cst_95 = arith.constant 0.000000e+00 : f32
      %142 = vector.broadcast %cst_95 : f32 to vector<4x2x128xf32>
      %c0_96 = arith.constant 0 : index
      %c0_97 = arith.constant 0 : index
      %c0_98 = arith.constant 0 : index
      %143 = vector.load %arg5[%c0_96, %c0_97, %c0_98] : memref<4x2x128xf32, #tpu.memory_space<vmem>>, vector<4x2x128xf32>
      tpu.vector_store %arg5[%c0_96, %c0_97, %c0_98], %142 {strides = array<i32>} : memref<4x2x128xf32, #tpu.memory_space<vmem>>, vector<4x2x128xf32>,
      %cst_99 = arith.constant 0.000000e+00 : f32
      %144 = vector.broadcast %cst_99 : f32 to vector<4x2x128xf32>
      %c0_100 = arith.constant 0 : index
      %c0_101 = arith.constant 0 : index
      %c0_102 = arith.constant 0 : index
      %145 = vector.load %arg6[%c0_100, %c0_101, %c0_102] : memref<4x2x128xf32, #tpu.memory_space<vmem>>, vector<4x2x128xf32>
      tpu.vector_store %arg6[%c0_100, %c0_101, %c0_102], %144 {strides = array<i32>} : memref<4x2x128xf32, #tpu.memory_space<vmem>>, vector<4x2x128xf32>,
      %cst_103 = arith.constant 0.000000e+00 : f32
      %146 = vector.broadcast %cst_103 : f32 to vector<4x2x128xf32>
      %c0_104 = arith.constant 0 : index
      %c0_105 = arith.constant 0 : index
      %c0_106 = arith.constant 0 : index
      %147 = vector.load %arg7[%c0_104, %c0_105, %c0_106] : memref<4x2x128xf32, #tpu.memory_space<vmem>>, vector<4x2x128xf32>
      tpu.vector_store %arg7[%c0_104, %c0_105, %c0_106], %146 {strides = array<i32>} : memref<4x2x128xf32, #tpu.memory_space<vmem>>, vector<4x2x128xf32>,
      %cst_107 = arith.constant 0.000000e+00 : f32
      %148 = vector.broadcast %cst_107 : f32 to vector<2x128xf32>
      %c0_108 = arith.constant 0 : index
      %c0_109 = arith.constant 0 : index
      %149 = vector.load %arg8[%c0_108, %c0_109] : memref<2x128xf32, #tpu.memory_space<vmem>>, vector<2x128xf32>
      tpu.vector_store %arg8[%c0_108, %c0_109], %148 {strides = array<i32>} : memref<2x128xf32, #tpu.memory_space<vmem>>, vector<2x128xf32>,
    } else {
    }
    %c0 = arith.constant 0 : index
    %c0_1 = arith.constant 0 : index
    %c0_2 = arith.constant 0 : index
    %3 = vector.load %arg3[%c0, %c0_1, %c0_2] : memref<1x2x128xi32, #tpu.memory_space<vmem>>, vector<1x2x128xi32>
    %4 = vector.shape_cast %3 : vector<1x2x128xi32> to vector<2x128xi32>
    %c0_3 = arith.constant 0 : index
    %c0_4 = arith.constant 0 : index
    %c0_5 = arith.constant 0 : index
    %c0_6 = arith.constant 0 : index
    %5 = vector.load %arg2[%c0_3, %c0_4, %c0_5, %c0_6] : memref<1x4x2x128xf32, #tpu.memory_space<vmem>>, vector<1x1x2x128xf32>
    %6 = vector.shape_cast %5 : vector<1x1x2x128xf32> to vector<2x128xf32>
    %c0_7 = arith.constant 0 : index
    %c1 = arith.constant 1 : index
    %c0_8 = arith.constant 0 : index
    %c0_9 = arith.constant 0 : index
    %7 = vector.load %arg2[%c0_7, %c1, %c0_8, %c0_9] : memref<1x4x2x128xf32, #tpu.memory_space<vmem>>, vector<1x1x2x128xf32>
    %8 = vector.shape_cast %7 : vector<1x1x2x128xf32> to vector<2x128xf32>
    %c0_10 = arith.constant 0 : index
    %c2 = arith.constant 2 : index
    %c0_11 = arith.constant 0 : index
    %c0_12 = arith.constant 0 : index
    %9 = vector.load %arg2[%c0_10, %c2, %c0_11, %c0_12] : memref<1x4x2x128xf32, #tpu.memory_space<vmem>>, vector<1x1x2x128xf32>
    %10 = vector.shape_cast %9 : vector<1x1x2x128xf32> to vector<2x128xf32>
    %c0_13 = arith.constant 0 : index
    %c3 = arith.constant 3 : index
    %c0_14 = arith.constant 0 : index
    %c0_15 = arith.constant 0 : index
    %11 = vector.load %arg2[%c0_13, %c3, %c0_14, %c0_15] : memref<1x4x2x128xf32, #tpu.memory_space<vmem>>, vector<1x1x2x128xf32>
    %12 = vector.shape_cast %11 : vector<1x1x2x128xf32> to vector<2x128xf32>
    %13 = arith.maximumf %6, %8 : vector<2x128xf32>
    %14 = arith.maximumf %13, %10 : vector<2x128xf32>
    %15 = arith.maximumf %14, %12 : vector<2x128xf32>
    %cst = arith.constant 0.000000e+00 : f32
    %16 = vector.broadcast %cst : f32 to vector<2x128xf32>
    %c0_i32_16 = arith.constant 0 : i32
    %17 = vector.broadcast %c0_i32_16 : i32 to vector<2x128xi32>
    %18 = arith.cmpi eq, %4, %17 : vector<2x128xi32>
    %19 = arith.extui %18 : vector<2x128xi1> to vector<2x128xi32>
    %20 = arith.sitofp %19 : vector<2x128xi32> to vector<2x128xf32>
    %21 = arith.mulf %20, %6 : vector<2x128xf32>
    %22 = arith.addf %16, %21 : vector<2x128xf32>
    %23 = arith.subf %6, %15 : vector<2x128xf32>
    %24 = math.exp %23 : vector<2x128xf32>
    %c1_i32 = arith.constant 1 : i32
    %25 = vector.broadcast %c1_i32 : i32 to vector<2x128xi32>
    %26 = arith.cmpi eq, %4, %25 : vector<2x128xi32>
    %27 = arith.extui %26 : vector<2x128xi1> to vector<2x128xi32>
    %28 = arith.sitofp %27 : vector<2x128xi32> to vector<2x128xf32>
    %29 = arith.mulf %28, %8 : vector<2x128xf32>
    %30 = arith.addf %22, %29 : vector<2x128xf32>
    %31 = arith.subf %8, %15 : vector<2x128xf32>
    %32 = math.exp %31 : vector<2x128xf32>
    %c2_i32 = arith.constant 2 : i32
    %33 = vector.broadcast %c2_i32 : i32 to vector<2x128xi32>
    %34 = arith.cmpi eq, %4, %33 : vector<2x128xi32>
    %35 = arith.extui %34 : vector<2x128xi1> to vector<2x128xi32>
    %36 = arith.sitofp %35 : vector<2x128xi32> to vector<2x128xf32>
    %37 = arith.mulf %36, %10 : vector<2x128xf32>
    %38 = arith.addf %30, %37 : vector<2x128xf32>
    %39 = arith.subf %10, %15 : vector<2x128xf32>
    %40 = math.exp %39 : vector<2x128xf32>
    %c3_i32 = arith.constant 3 : i32
    %41 = vector.broadcast %c3_i32 : i32 to vector<2x128xi32>
    %42 = arith.cmpi eq, %4, %41 : vector<2x128xi32>
    %43 = arith.extui %42 : vector<2x128xi1> to vector<2x128xi32>
    %44 = arith.sitofp %43 : vector<2x128xi32> to vector<2x128xf32>
    %45 = arith.mulf %44, %12 : vector<2x128xf32>
    %46 = arith.addf %38, %45 : vector<2x128xf32>
    %47 = arith.subf %12, %15 : vector<2x128xf32>
    %48 = math.exp %47 : vector<2x128xf32>
    %49 = arith.addf %24, %32 : vector<2x128xf32>
    %50 = arith.addf %49, %40 : vector<2x128xf32>
    %51 = arith.addf %50, %48 : vector<2x128xf32>
    %52 = tpu.reciprocal %51 : vector<2x128xf32> -> vector<2x128xf32>
    %53 = arith.mulf %24, %52 : vector<2x128xf32>
    %c0_17 = arith.constant 0 : index
    %c0_18 = arith.constant 0 : index
    %c0_19 = arith.constant 0 : index
    %54 = vector.load %arg5[%c0_17, %c0_18, %c0_19] : memref<4x2x128xf32, #tpu.memory_space<vmem>>, vector<1x2x128xf32>
    %55 = vector.shape_cast %54 : vector<1x2x128xf32> to vector<2x128xf32>
    %56 = arith.mulf %20, %53 : vector<2x128xf32>
    %57 = arith.addf %55, %56 : vector<2x128xf32>
    %c0_20 = arith.constant 0 : index
    %c0_21 = arith.constant 0 : index
    %c0_22 = arith.constant 0 : index
    %58 = vector.load %arg5[%c0_20, %c0_21, %c0_22] : memref<4x2x128xf32, #tpu.memory_space<vmem>>, vector<1x2x128xf32>
    %59 = vector.shape_cast %58 : vector<1x2x128xf32> to vector<2x128xf32>
    %60 = vector.shape_cast %57 : vector<2x128xf32> to vector<1x2x128xf32>
    tpu.vector_store %arg5[%c0_20, %c0_21, %c0_22], %60 {strides = array<i32>} : memref<4x2x128xf32, #tpu.memory_space<vmem>>, vector<1x2x128xf32>,
    %c0_23 = arith.constant 0 : index
    %c0_24 = arith.constant 0 : index
    %c0_25 = arith.constant 0 : index
    %61 = vector.load %arg6[%c0_23, %c0_24, %c0_25] : memref<4x2x128xf32, #tpu.memory_space<vmem>>, vector<1x2x128xf32>
    %62 = vector.shape_cast %61 : vector<1x2x128xf32> to vector<2x128xf32>
    %63 = arith.addf %62, %20 : vector<2x128xf32>
    %c0_26 = arith.constant 0 : index
    %c0_27 = arith.constant 0 : index
    %c0_28 = arith.constant 0 : index
    %64 = vector.load %arg6[%c0_26, %c0_27, %c0_28] : memref<4x2x128xf32, #tpu.memory_space<vmem>>, vector<1x2x128xf32>
    %65 = vector.shape_cast %64 : vector<1x2x128xf32> to vector<2x128xf32>
    %66 = vector.shape_cast %63 : vector<2x128xf32> to vector<1x2x128xf32>
    tpu.vector_store %arg6[%c0_26, %c0_27, %c0_28], %66 {strides = array<i32>} : memref<4x2x128xf32, #tpu.memory_space<vmem>>, vector<1x2x128xf32>,
    %c0_29 = arith.constant 0 : index
    %c0_30 = arith.constant 0 : index
    %c0_31 = arith.constant 0 : index
    %67 = vector.load %arg7[%c0_29, %c0_30, %c0_31] : memref<4x2x128xf32, #tpu.memory_space<vmem>>, vector<1x2x128xf32>
    %68 = vector.shape_cast %67 : vector<1x2x128xf32> to vector<2x128xf32>
    %69 = arith.addf %68, %53 : vector<2x128xf32>
    %c0_32 = arith.constant 0 : index
    %c0_33 = arith.constant 0 : index
    %c0_34 = arith.constant 0 : index
    %70 = vector.load %arg7[%c0_32, %c0_33, %c0_34] : memref<4x2x128xf32, #tpu.memory_space<vmem>>, vector<1x2x128xf32>
    %71 = vector.shape_cast %70 : vector<1x2x128xf32> to vector<2x128xf32>
    %72 = vector.shape_cast %69 : vector<2x128xf32> to vector<1x2x128xf32>
    tpu.vector_store %arg7[%c0_32, %c0_33, %c0_34], %72 {strides = array<i32>} : memref<4x2x128xf32, #tpu.memory_space<vmem>>, vector<1x2x128xf32>,
    %73 = arith.mulf %32, %52 : vector<2x128xf32>
    %c1_35 = arith.constant 1 : index
    %c0_36 = arith.constant 0 : index
    %c0_37 = arith.constant 0 : index
    %74 = vector.load %arg5[%c1_35, %c0_36, %c0_37] : memref<4x2x128xf32, #tpu.memory_space<vmem>>, vector<1x2x128xf32>
    %75 = vector.shape_cast %74 : vector<1x2x128xf32> to vector<2x128xf32>
    %76 = arith.mulf %28, %73 : vector<2x128xf32>
    %77 = arith.addf %75, %76 : vector<2x128xf32>
    %c1_38 = arith.constant 1 : index
    %c0_39 = arith.constant 0 : index
    %c0_40 = arith.constant 0 : index
    %78 = vector.load %arg5[%c1_38, %c0_39, %c0_40] : memref<4x2x128xf32, #tpu.memory_space<vmem>>, vector<1x2x128xf32>
    %79 = vector.shape_cast %78 : vector<1x2x128xf32> to vector<2x128xf32>
    %80 = vector.shape_cast %77 : vector<2x128xf32> to vector<1x2x128xf32>
    tpu.vector_store %arg5[%c1_38, %c0_39, %c0_40], %80 {strides = array<i32>} : memref<4x2x128xf32, #tpu.memory_space<vmem>>, vector<1x2x128xf32>,
    %c1_41 = arith.constant 1 : index
    %c0_42 = arith.constant 0 : index
    %c0_43 = arith.constant 0 : index
    %81 = vector.load %arg6[%c1_41, %c0_42, %c0_43] : memref<4x2x128xf32, #tpu.memory_space<vmem>>, vector<1x2x128xf32>
    %82 = vector.shape_cast %81 : vector<1x2x128xf32> to vector<2x128xf32>
    %83 = arith.addf %82, %28 : vector<2x128xf32>
    %c1_44 = arith.constant 1 : index
    %c0_45 = arith.constant 0 : index
    %c0_46 = arith.constant 0 : index
    %84 = vector.load %arg6[%c1_44, %c0_45, %c0_46] : memref<4x2x128xf32, #tpu.memory_space<vmem>>, vector<1x2x128xf32>
    %85 = vector.shape_cast %84 : vector<1x2x128xf32> to vector<2x128xf32>
    %86 = vector.shape_cast %83 : vector<2x128xf32> to vector<1x2x128xf32>
    tpu.vector_store %arg6[%c1_44, %c0_45, %c0_46], %86 {strides = array<i32>} : memref<4x2x128xf32, #tpu.memory_space<vmem>>, vector<1x2x128xf32>,
    %c1_47 = arith.constant 1 : index
    %c0_48 = arith.constant 0 : index
    %c0_49 = arith.constant 0 : index
    %87 = vector.load %arg7[%c1_47, %c0_48, %c0_49] : memref<4x2x128xf32, #tpu.memory_space<vmem>>, vector<1x2x128xf32>
    %88 = vector.shape_cast %87 : vector<1x2x128xf32> to vector<2x128xf32>
    %89 = arith.addf %88, %73 : vector<2x128xf32>
    %c1_50 = arith.constant 1 : index
    %c0_51 = arith.constant 0 : index
    %c0_52 = arith.constant 0 : index
    %90 = vector.load %arg7[%c1_50, %c0_51, %c0_52] : memref<4x2x128xf32, #tpu.memory_space<vmem>>, vector<1x2x128xf32>
    %91 = vector.shape_cast %90 : vector<1x2x128xf32> to vector<2x128xf32>
    %92 = vector.shape_cast %89 : vector<2x128xf32> to vector<1x2x128xf32>
    tpu.vector_store %arg7[%c1_50, %c0_51, %c0_52], %92 {strides = array<i32>} : memref<4x2x128xf32, #tpu.memory_space<vmem>>, vector<1x2x128xf32>,
    %93 = arith.mulf %40, %52 : vector<2x128xf32>
    %c2_53 = arith.constant 2 : index
    %c0_54 = arith.constant 0 : index
    %c0_55 = arith.constant 0 : index
    %94 = vector.load %arg5[%c2_53, %c0_54, %c0_55] : memref<4x2x128xf32, #tpu.memory_space<vmem>>, vector<1x2x128xf32>
    %95 = vector.shape_cast %94 : vector<1x2x128xf32> to vector<2x128xf32>
    %96 = arith.mulf %36, %93 : vector<2x128xf32>
    %97 = arith.addf %95, %96 : vector<2x128xf32>
    %c2_56 = arith.constant 2 : index
    %c0_57 = arith.constant 0 : index
    %c0_58 = arith.constant 0 : index
    %98 = vector.load %arg5[%c2_56, %c0_57, %c0_58] : memref<4x2x128xf32, #tpu.memory_space<vmem>>, vector<1x2x128xf32>
    %99 = vector.shape_cast %98 : vector<1x2x128xf32> to vector<2x128xf32>
    %100 = vector.shape_cast %97 : vector<2x128xf32> to vector<1x2x128xf32>
    tpu.vector_store %arg5[%c2_56, %c0_57, %c0_58], %100 {strides = array<i32>} : memref<4x2x128xf32, #tpu.memory_space<vmem>>, vector<1x2x128xf32>,
    %c2_59 = arith.constant 2 : index
    %c0_60 = arith.constant 0 : index
    %c0_61 = arith.constant 0 : index
    %101 = vector.load %arg6[%c2_59, %c0_60, %c0_61] : memref<4x2x128xf32, #tpu.memory_space<vmem>>, vector<1x2x128xf32>
    %102 = vector.shape_cast %101 : vector<1x2x128xf32> to vector<2x128xf32>
    %103 = arith.addf %102, %36 : vector<2x128xf32>
    %c2_62 = arith.constant 2 : index
    %c0_63 = arith.constant 0 : index
    %c0_64 = arith.constant 0 : index
    %104 = vector.load %arg6[%c2_62, %c0_63, %c0_64] : memref<4x2x128xf32, #tpu.memory_space<vmem>>, vector<1x2x128xf32>
    %105 = vector.shape_cast %104 : vector<1x2x128xf32> to vector<2x128xf32>
    %106 = vector.shape_cast %103 : vector<2x128xf32> to vector<1x2x128xf32>
    tpu.vector_store %arg6[%c2_62, %c0_63, %c0_64], %106 {strides = array<i32>} : memref<4x2x128xf32, #tpu.memory_space<vmem>>, vector<1x2x128xf32>,
    %c2_65 = arith.constant 2 : index
    %c0_66 = arith.constant 0 : index
    %c0_67 = arith.constant 0 : index
    %107 = vector.load %arg7[%c2_65, %c0_66, %c0_67] : memref<4x2x128xf32, #tpu.memory_space<vmem>>, vector<1x2x128xf32>
    %108 = vector.shape_cast %107 : vector<1x2x128xf32> to vector<2x128xf32>
    %109 = arith.addf %108, %93 : vector<2x128xf32>
    %c2_68 = arith.constant 2 : index
    %c0_69 = arith.constant 0 : index
    %c0_70 = arith.constant 0 : index
    %110 = vector.load %arg7[%c2_68, %c0_69, %c0_70] : memref<4x2x128xf32, #tpu.memory_space<vmem>>, vector<1x2x128xf32>
    %111 = vector.shape_cast %110 : vector<1x2x128xf32> to vector<2x128xf32>
    %112 = vector.shape_cast %109 : vector<2x128xf32> to vector<1x2x128xf32>
    tpu.vector_store %arg7[%c2_68, %c0_69, %c0_70], %112 {strides = array<i32>} : memref<4x2x128xf32, #tpu.memory_space<vmem>>, vector<1x2x128xf32>,
    %113 = arith.mulf %48, %52 : vector<2x128xf32>
    %c3_71 = arith.constant 3 : index
    %c0_72 = arith.constant 0 : index
    %c0_73 = arith.constant 0 : index
    %114 = vector.load %arg5[%c3_71, %c0_72, %c0_73] : memref<4x2x128xf32, #tpu.memory_space<vmem>>, vector<1x2x128xf32>
    %115 = vector.shape_cast %114 : vector<1x2x128xf32> to vector<2x128xf32>
    %116 = arith.mulf %44, %113 : vector<2x128xf32>
    %117 = arith.addf %115, %116 : vector<2x128xf32>
    %c3_74 = arith.constant 3 : index
    %c0_75 = arith.constant 0 : index
    %c0_76 = arith.constant 0 : index
    %118 = vector.load %arg5[%c3_74, %c0_75, %c0_76] : memref<4x2x128xf32, #tpu.memory_space<vmem>>, vector<1x2x128xf32>
    %119 = vector.shape_cast %118 : vector<1x2x128xf32> to vector<2x128xf32>
    %120 = vector.shape_cast %117 : vector<2x128xf32> to vector<1x2x128xf32>
    tpu.vector_store %arg5[%c3_74, %c0_75, %c0_76], %120 {strides = array<i32>} : memref<4x2x128xf32, #tpu.memory_space<vmem>>, vector<1x2x128xf32>,
    %c3_77 = arith.constant 3 : index
    %c0_78 = arith.constant 0 : index
    %c0_79 = arith.constant 0 : index
    %121 = vector.load %arg6[%c3_77, %c0_78, %c0_79] : memref<4x2x128xf32, #tpu.memory_space<vmem>>, vector<1x2x128xf32>
    %122 = vector.shape_cast %121 : vector<1x2x128xf32> to vector<2x128xf32>
    %123 = arith.addf %122, %44 : vector<2x128xf32>
    %c3_80 = arith.constant 3 : index
    %c0_81 = arith.constant 0 : index
    %c0_82 = arith.constant 0 : index
    %124 = vector.load %arg6[%c3_80, %c0_81, %c0_82] : memref<4x2x128xf32, #tpu.memory_space<vmem>>, vector<1x2x128xf32>
    %125 = vector.shape_cast %124 : vector<1x2x128xf32> to vector<2x128xf32>
    %126 = vector.shape_cast %123 : vector<2x128xf32> to vector<1x2x128xf32>
    tpu.vector_store %arg6[%c3_80, %c0_81, %c0_82], %126 {strides = array<i32>} : memref<4x2x128xf32, #tpu.memory_space<vmem>>, vector<1x2x128xf32>,
    %c3_83 = arith.constant 3 : index
    %c0_84 = arith.constant 0 : index
    %c0_85 = arith.constant 0 : index
    %127 = vector.load %arg7[%c3_83, %c0_84, %c0_85] : memref<4x2x128xf32, #tpu.memory_space<vmem>>, vector<1x2x128xf32>
    %128 = vector.shape_cast %127 : vector<1x2x128xf32> to vector<2x128xf32>
    %129 = arith.addf %128, %113 : vector<2x128xf32>
    %c3_86 = arith.constant 3 : index
    %c0_87 = arith.constant 0 : index
    %c0_88 = arith.constant 0 : index
    %130 = vector.load %arg7[%c3_86, %c0_87, %c0_88] : memref<4x2x128xf32, #tpu.memory_space<vmem>>, vector<1x2x128xf32>
    %131 = vector.shape_cast %130 : vector<1x2x128xf32> to vector<2x128xf32>
    %132 = vector.shape_cast %129 : vector<2x128xf32> to vector<1x2x128xf32>
    tpu.vector_store %arg7[%c3_86, %c0_87, %c0_88], %132 {strides = array<i32>} : memref<4x2x128xf32, #tpu.memory_space<vmem>>, vector<1x2x128xf32>,
    %133 = math.log %51 : vector<2x128xf32>
    %134 = arith.addf %15, %133 : vector<2x128xf32>
    %c0_89 = arith.constant 0 : index
    %c0_90 = arith.constant 0 : index
    %135 = vector.load %arg8[%c0_89, %c0_90] : memref<2x128xf32, #tpu.memory_space<vmem>>, vector<2x128xf32>
    %136 = arith.subf %134, %46 : vector<2x128xf32>
    %137 = arith.addf %135, %136 : vector<2x128xf32>
    %c0_91 = arith.constant 0 : index
    %c0_92 = arith.constant 0 : index
    %138 = vector.load %arg8[%c0_91, %c0_92] : memref<2x128xf32, #tpu.memory_space<vmem>>, vector<2x128xf32>
    tpu.vector_store %arg8[%c0_91, %c0_92], %137 {strides = array<i32>} : memref<2x128xf32, #tpu.memory_space<vmem>>, vector<2x128xf32>,
    %c0_i32_93 = arith.constant 0 : i32
    %139 = arith.cmpi eq, %arg1, %c0_i32_93 : i32
    %140 = arith.extui %139 : i1 to i32
    %c0_i32_94 = arith.constant 0 : i32
    %141 = arith.cmpi ne, %140, %c0_i32_94 : i32
    scf.if %141 {
      %c0_95 = arith.constant 0 : index
      %c0_96 = arith.constant 0 : index
      %c0_97 = arith.constant 0 : index
      %142 = vector.load %arg5[%c0_95, %c0_96, %c0_97] : memref<4x2x128xf32, #tpu.memory_space<vmem>>, vector<1x2x128xf32>
      %143 = vector.shape_cast %142 : vector<1x2x128xf32> to vector<2x128xf32>
      %144 = vector.shape_cast %143 : vector<2x128xf32> to vector<1x2x128xf32>
      %cst_98 = arith.constant dense<0.000000e+00> : vector<1xf32>
      %145 = vector.multi_reduction <add>, %144, %cst_98 [1, 2] : vector<1x2x128xf32> to vector<1xf32>
      %146 = vector.shape_cast %145 : vector<1xf32> to vector<1x1x1xf32>
      %147 = vector.extract %146[0, 0, 0] : f32 from vector<1x1x1xf32>
      %c0_99 = arith.constant 0 : index
      %c0_100 = arith.constant 0 : index
      %c0_101 = arith.constant 0 : index
      %148 = vector.load %arg6[%c0_99, %c0_100, %c0_101] : memref<4x2x128xf32, #tpu.memory_space<vmem>>, vector<1x2x128xf32>
      %149 = vector.shape_cast %148 : vector<1x2x128xf32> to vector<2x128xf32>
      %150 = vector.shape_cast %149 : vector<2x128xf32> to vector<1x2x128xf32>
      %cst_102 = arith.constant dense<0.000000e+00> : vector<1xf32>
      %151 = vector.multi_reduction <add>, %150, %cst_102 [1, 2] : vector<1x2x128xf32> to vector<1xf32>
      %152 = vector.shape_cast %151 : vector<1xf32> to vector<1x1x1xf32>
      %153 = vector.extract %152[0, 0, 0] : f32 from vector<1x1x1xf32>
      %c0_103 = arith.constant 0 : index
      %c0_104 = arith.constant 0 : index
      %c0_105 = arith.constant 0 : index
      %154 = vector.load %arg7[%c0_103, %c0_104, %c0_105] : memref<4x2x128xf32, #tpu.memory_space<vmem>>, vector<1x2x128xf32>
      %155 = vector.shape_cast %154 : vector<1x2x128xf32> to vector<2x128xf32>
      %156 = vector.shape_cast %155 : vector<2x128xf32> to vector<1x2x128xf32>
      %cst_106 = arith.constant dense<0.000000e+00> : vector<1xf32>
      %157 = vector.multi_reduction <add>, %156, %cst_106 [1, 2] : vector<1x2x128xf32> to vector<1xf32>
      %158 = vector.shape_cast %157 : vector<1xf32> to vector<1x1x1xf32>
      %159 = vector.extract %158[0, 0, 0] : f32 from vector<1x1x1xf32>
      %cst_107 = arith.constant 2.000000e+00 : f32
      %160 = arith.mulf %cst_107, %147 : f32
      %cst_108 = arith.constant 9.99999974E-6 : f32
      %161 = arith.addf %160, %cst_108 : f32
      %162 = arith.addf %153, %159 : f32
      %cst_109 = arith.constant 9.99999974E-6 : f32
      %163 = arith.addf %162, %cst_109 : f32
      %164 = arith.divf %161, %163 : f32
      %cst_110 = arith.constant 1.000000e+00 : f32
      %165 = arith.subf %cst_110, %164 : f32
      %cst_111 = arith.constant 0.000000e+00 : f32
      %166 = arith.addf %cst_111, %165 : f32
      %c1_112 = arith.constant 1 : index
      %c0_113 = arith.constant 0 : index
      %c0_114 = arith.constant 0 : index
      %167 = vector.load %arg5[%c1_112, %c0_113, %c0_114] : memref<4x2x128xf32, #tpu.memory_space<vmem>>, vector<1x2x128xf32>
      %168 = vector.shape_cast %167 : vector<1x2x128xf32> to vector<2x128xf32>
      %169 = vector.shape_cast %168 : vector<2x128xf32> to vector<1x2x128xf32>
      %cst_115 = arith.constant dense<0.000000e+00> : vector<1xf32>
      %170 = vector.multi_reduction <add>, %169, %cst_115 [1, 2] : vector<1x2x128xf32> to vector<1xf32>
      %171 = vector.shape_cast %170 : vector<1xf32> to vector<1x1x1xf32>
      %172 = vector.extract %171[0, 0, 0] : f32 from vector<1x1x1xf32>
      %c1_116 = arith.constant 1 : index
      %c0_117 = arith.constant 0 : index
      %c0_118 = arith.constant 0 : index
      %173 = vector.load %arg6[%c1_116, %c0_117, %c0_118] : memref<4x2x128xf32, #tpu.memory_space<vmem>>, vector<1x2x128xf32>
      %174 = vector.shape_cast %173 : vector<1x2x128xf32> to vector<2x128xf32>
      %175 = vector.shape_cast %174 : vector<2x128xf32> to vector<1x2x128xf32>
      %cst_119 = arith.constant dense<0.000000e+00> : vector<1xf32>
      %176 = vector.multi_reduction <add>, %175, %cst_119 [1, 2] : vector<1x2x128xf32> to vector<1xf32>
      %177 = vector.shape_cast %176 : vector<1xf32> to vector<1x1x1xf32>
      %178 = vector.extract %177[0, 0, 0] : f32 from vector<1x1x1xf32>
      %c1_120 = arith.constant 1 : index
      %c0_121 = arith.constant 0 : index
      %c0_122 = arith.constant 0 : index
      %179 = vector.load %arg7[%c1_120, %c0_121, %c0_122] : memref<4x2x128xf32, #tpu.memory_space<vmem>>, vector<1x2x128xf32>
      %180 = vector.shape_cast %179 : vector<1x2x128xf32> to vector<2x128xf32>
      %181 = vector.shape_cast %180 : vector<2x128xf32> to vector<1x2x128xf32>
      %cst_123 = arith.constant dense<0.000000e+00> : vector<1xf32>
      %182 = vector.multi_reduction <add>, %181, %cst_123 [1, 2] : vector<1x2x128xf32> to vector<1xf32>
      %183 = vector.shape_cast %182 : vector<1xf32> to vector<1x1x1xf32>
      %184 = vector.extract %183[0, 0, 0] : f32 from vector<1x1x1xf32>
      %cst_124 = arith.constant 2.000000e+00 : f32
      %185 = arith.mulf %cst_124, %172 : f32
      %cst_125 = arith.constant 9.99999974E-6 : f32
      %186 = arith.addf %185, %cst_125 : f32
      %187 = arith.addf %178, %184 : f32
      %cst_126 = arith.constant 9.99999974E-6 : f32
      %188 = arith.addf %187, %cst_126 : f32
      %189 = arith.divf %186, %188 : f32
      %cst_127 = arith.constant 1.000000e+00 : f32
      %190 = arith.subf %cst_127, %189 : f32
      %191 = arith.addf %166, %190 : f32
      %c2_128 = arith.constant 2 : index
      %c0_129 = arith.constant 0 : index
      %c0_130 = arith.constant 0 : index
      %192 = vector.load %arg5[%c2_128, %c0_129, %c0_130] : memref<4x2x128xf32, #tpu.memory_space<vmem>>, vector<1x2x128xf32>
      %193 = vector.shape_cast %192 : vector<1x2x128xf32> to vector<2x128xf32>
      %194 = vector.shape_cast %193 : vector<2x128xf32> to vector<1x2x128xf32>
      %cst_131 = arith.constant dense<0.000000e+00> : vector<1xf32>
      %195 = vector.multi_reduction <add>, %194, %cst_131 [1, 2] : vector<1x2x128xf32> to vector<1xf32>
      %196 = vector.shape_cast %195 : vector<1xf32> to vector<1x1x1xf32>
      %197 = vector.extract %196[0, 0, 0] : f32 from vector<1x1x1xf32>
      %c2_132 = arith.constant 2 : index
      %c0_133 = arith.constant 0 : index
      %c0_134 = arith.constant 0 : index
      %198 = vector.load %arg6[%c2_132, %c0_133, %c0_134] : memref<4x2x128xf32, #tpu.memory_space<vmem>>, vector<1x2x128xf32>
      %199 = vector.shape_cast %198 : vector<1x2x128xf32> to vector<2x128xf32>
      %200 = vector.shape_cast %199 : vector<2x128xf32> to vector<1x2x128xf32>
      %cst_135 = arith.constant dense<0.000000e+00> : vector<1xf32>
      %201 = vector.multi_reduction <add>, %200, %cst_135 [1, 2] : vector<1x2x128xf32> to vector<1xf32>
      %202 = vector.shape_cast %201 : vector<1xf32> to vector<1x1x1xf32>
      %203 = vector.extract %202[0, 0, 0] : f32 from vector<1x1x1xf32>
      %c2_136 = arith.constant 2 : index
      %c0_137 = arith.constant 0 : index
      %c0_138 = arith.constant 0 : index
      %204 = vector.load %arg7[%c2_136, %c0_137, %c0_138] : memref<4x2x128xf32, #tpu.memory_space<vmem>>, vector<1x2x128xf32>
      %205 = vector.shape_cast %204 : vector<1x2x128xf32> to vector<2x128xf32>
      %206 = vector.shape_cast %205 : vector<2x128xf32> to vector<1x2x128xf32>
      %cst_139 = arith.constant dense<0.000000e+00> : vector<1xf32>
      %207 = vector.multi_reduction <add>, %206, %cst_139 [1, 2] : vector<1x2x128xf32> to vector<1xf32>
      %208 = vector.shape_cast %207 : vector<1xf32> to vector<1x1x1xf32>
      %209 = vector.extract %208[0, 0, 0] : f32 from vector<1x1x1xf32>
      %cst_140 = arith.constant 2.000000e+00 : f32
      %210 = arith.mulf %cst_140, %197 : f32
      %cst_141 = arith.constant 9.99999974E-6 : f32
      %211 = arith.addf %210, %cst_141 : f32
      %212 = arith.addf %203, %209 : f32
      %cst_142 = arith.constant 9.99999974E-6 : f32
      %213 = arith.addf %212, %cst_142 : f32
      %214 = arith.divf %211, %213 : f32
      %cst_143 = arith.constant 1.000000e+00 : f32
      %215 = arith.subf %cst_143, %214 : f32
      %216 = arith.addf %191, %215 : f32
      %c3_144 = arith.constant 3 : index
      %c0_145 = arith.constant 0 : index
      %c0_146 = arith.constant 0 : index
      %217 = vector.load %arg5[%c3_144, %c0_145, %c0_146] : memref<4x2x128xf32, #tpu.memory_space<vmem>>, vector<1x2x128xf32>
      %218 = vector.shape_cast %217 : vector<1x2x128xf32> to vector<2x128xf32>
      %219 = vector.shape_cast %218 : vector<2x128xf32> to vector<1x2x128xf32>
      %cst_147 = arith.constant dense<0.000000e+00> : vector<1xf32>
      %220 = vector.multi_reduction <add>, %219, %cst_147 [1, 2] : vector<1x2x128xf32> to vector<1xf32>
      %221 = vector.shape_cast %220 : vector<1xf32> to vector<1x1x1xf32>
      %222 = vector.extract %221[0, 0, 0] : f32 from vector<1x1x1xf32>
      %c3_148 = arith.constant 3 : index
      %c0_149 = arith.constant 0 : index
      %c0_150 = arith.constant 0 : index
      %223 = vector.load %arg6[%c3_148, %c0_149, %c0_150] : memref<4x2x128xf32, #tpu.memory_space<vmem>>, vector<1x2x128xf32>
      %224 = vector.shape_cast %223 : vector<1x2x128xf32> to vector<2x128xf32>
      %225 = vector.shape_cast %224 : vector<2x128xf32> to vector<1x2x128xf32>
      %cst_151 = arith.constant dense<0.000000e+00> : vector<1xf32>
      %226 = vector.multi_reduction <add>, %225, %cst_151 [1, 2] : vector<1x2x128xf32> to vector<1xf32>
      %227 = vector.shape_cast %226 : vector<1xf32> to vector<1x1x1xf32>
      %228 = vector.extract %227[0, 0, 0] : f32 from vector<1x1x1xf32>
      %c3_152 = arith.constant 3 : index
      %c0_153 = arith.constant 0 : index
      %c0_154 = arith.constant 0 : index
      %229 = vector.load %arg7[%c3_152, %c0_153, %c0_154] : memref<4x2x128xf32, #tpu.memory_space<vmem>>, vector<1x2x128xf32>
      %230 = vector.shape_cast %229 : vector<1x2x128xf32> to vector<2x128xf32>
      %231 = vector.shape_cast %230 : vector<2x128xf32> to vector<1x2x128xf32>
      %cst_155 = arith.constant dense<0.000000e+00> : vector<1xf32>
      %232 = vector.multi_reduction <add>, %231, %cst_155 [1, 2] : vector<1x2x128xf32> to vector<1xf32>
      %233 = vector.shape_cast %232 : vector<1xf32> to vector<1x1x1xf32>
      %234 = vector.extract %233[0, 0, 0] : f32 from vector<1x1x1xf32>
      %cst_156 = arith.constant 2.000000e+00 : f32
      %235 = arith.mulf %cst_156, %222 : f32
      %cst_157 = arith.constant 9.99999974E-6 : f32
      %236 = arith.addf %235, %cst_157 : f32
      %237 = arith.addf %228, %234 : f32
      %cst_158 = arith.constant 9.99999974E-6 : f32
      %238 = arith.addf %237, %cst_158 : f32
      %239 = arith.divf %236, %238 : f32
      %cst_159 = arith.constant 1.000000e+00 : f32
      %240 = arith.subf %cst_159, %239 : f32
      %241 = arith.addf %216, %240 : f32
      %c0_160 = arith.constant 0 : index
      %c0_161 = arith.constant 0 : index
      %242 = vector.load %arg8[%c0_160, %c0_161] : memref<2x128xf32, #tpu.memory_space<vmem>>, vector<2x128xf32>
      %243 = vector.shape_cast %242 : vector<2x128xf32> to vector<1x2x128xf32>
      %cst_162 = arith.constant dense<0.000000e+00> : vector<1xf32>
      %244 = vector.multi_reduction <add>, %243, %cst_162 [1, 2] : vector<1x2x128xf32> to vector<1xf32>
      %245 = vector.shape_cast %244 : vector<1xf32> to vector<1x1x1xf32>
      %246 = vector.extract %245[0, 0, 0] : f32 from vector<1x1x1xf32>
      %cst_163 = arith.constant 8.000000e+00 : f32
      %247 = arith.divf %241, %cst_163 : f32
      %cst_164 = arith.constant 5.120000e+02 : f32
      %248 = arith.divf %246, %cst_164 : f32
      %249 = arith.addf %247, %248 : f32
      %250 = vector.broadcast %249 : f32 to vector<1x1x128xf32>
      %c0_165 = arith.constant 0 : index
      %c0_166 = arith.constant 0 : index
      %c0_167 = arith.constant 0 : index
      %251 = vector.load %arg4[%c0_165, %c0_166, %c0_167] : memref<1x1x128xf32, #tpu.memory_space<vmem>>, vector<1x1x128xf32>
      tpu.vector_store %arg4[%c0_165, %c0_166, %c0_167], %250 {strides = array<i32>} : memref<1x1x128xf32, #tpu.memory_space<vmem>>, vector<1x1x128xf32>,
    } else {
    }
    return
  }
  func.func @transform_0(%arg0: i32, %arg1: i32) -> (i32, i32, i32, i32) {
    %c0_i32 = arith.constant 0 : i32
    %c0_i32_0 = arith.constant 0 : i32
    %c0_i32_1 = arith.constant 0 : i32
    return %arg0, %c0_i32, %arg1, %c0_i32_0 : i32, i32, i32, i32
  }
  func.func @transform_1(%arg0: i32, %arg1: i32) -> (i32, i32, i32) {
    %c0_i32 = arith.constant 0 : i32
    %c0_i32_0 = arith.constant 0 : i32
    return %arg0, %arg1, %c0_i32 : i32, i32, i32
  }
  func.func @transform_2(%arg0: i32, %arg1: i32) -> (i32, i32, i32) {
    %c0_i32 = arith.constant 0 : i32
    %c0_i32_0 = arith.constant 0 : i32
    %c0_i32_1 = arith.constant 0 : i32
    return %arg0, %c0_i32, %c0_i32_0 : i32, i32, i32
  }
}

</mosaic_0001>

<bundles_post_ra>
// kernel: tpu_custom_call.1
= control target key start
LH: loop header
LB: loop body
LE: loop exit
PB: predicated region body
PF: predicated region fallthrough
CT: control target
= control target key end

     0   :  { %s1269_s0 = inlined_call_operand.hbm [shape: f32[2,4,2,128], index: 0, kind: input, shape index: {}]   ;;  %s1270_s1 = inlined_call_operand.hbm [shape: s32[2,2,128], index: 1, kind: input, shape index: {}]   ;;  %s1271_s2 = inlined_call_operand.hbm [shape: f32[2,1,128], index: 2, kind: output, shape index: {}]  }
   0x1   :  { %1274 = sst [smem:[#allocation15_spill]] %s1269_s0 }
   0x2   :  { %7 = vsyncpa [#allocation7], 0 }
   0x3   :  { %9 = vsyncpa [#allocation7 + $0x1], 0 }
   0x4   :  { %10 = vsyncpa [#allocation10], 0 }
   0x5   :  { %12 = vsyncpa [#allocation10 + $0x1], 0 }
   0x6   :  { %13 = vsyncpa [#allocation8], 0 }
   0x7   :  { %15 = vsyncpa [#allocation8 + $0x1], 0  ;;  %s965_s9 = smov 0   ;;  %s967_s10 = smov 0  }
   0x8   :  { %s969_s11 = smov 0   ;;  %s971_s12 = smov 0  }
   0x9   :  { %s973_s13 = smov 0   ;;  %s975_s14 = smov 0  }
   0xa LB: > { %s649_s15 = sadd.s32 4294967295, %s942_s14   ;;  %s650_s16 = sadd.s32 4294967294, %s942_s14   ;;  %s942_s14 = sphi %s975_s14, %s21_s14   ;;  %s938_s13 = sphi %s973_s13, %s1292_s13   ;;  %s934_s12 = sphi %s971_s12, %s1291_s12   ;;  %s930_s11 = sphi %s969_s11, %s1290_s11   ;;  %s926_s10 = sphi %s967_s10, %s1289_s10   ;;  %s922_s9 = sphi %s965_s9, %s1288_s9  }
   0xb   : > { %s33_s17 = sadd.s32 1, %s938_s13  ;;  %s42_s18 = sadd.s32 1, %s930_s11 }
   0xc   : > { %p35_p0 = scmp.ge.s32.totalorder %s33_s17, 2  ;;  %p49_p1 = scmp.ne.s32.totalorder %s930_s11, %s926_s10 }
   0xd   : > { %p50_p2 = scmp.eq.s32.totalorder %s942_s14, 0  ;;  %p55_p3 = scmp.ne.s32.totalorder %s926_s10, %s922_s9 }
   0xe   : > { %s1294_s17 = smov (%p35_p0, %s33_s17), 0  ;;  %p56_p5 = scmp.eq.s32.totalorder %s649_s15, 0 }
   0xf   : > { %p1006_p4 = por %p50_p2, %p49_p1  ;;  %s37_s20 = ssub.s32 %s938_s13, %s1294_s17 }
  0x10   : > { %p107_p6 = scmp.eq.s32.totalorder %s649_s15, 1  ;;  %p40_p7 = scmp.eq.s32.totalorder %s37_s20, 0 }
  0x11   : > { %p1012_p8 = por %p56_p5, %p55_p3  ;;  %p113_p10 = scmp.eq.s32.totalorder %s650_s16, 1 }
  0x12   : > { %p1016_p9 = por %p107_p6, %p49_p1  ;;  %p723_p13 = scmp.lt.s32.totalorder %s942_s14, 2 }
  0x13   : > { %s1276_s21 = scalar_select %p1012_p8, 1, 0 }
  0x14   : > { %s1277_s22 = scalar_select %p1016_p9, 1, 0 }
  0x15   : > { %s1021_s23 = scalar_select %p40_p7, %s930_s11, %s42_s18  }
  0x16   : > { %p1023_p11 = por %p113_p10, %p55_p3  ;;  %s1030_s25 = sand.u32 1, %s930_s11  }
  0x17   : > { %s653_s26 = sshll.u32 %s1030_s25, 3  ;;  %s671_s27 = sshll.u32 %s938_s13, 7 }
  0x18   : > { %s1278_s24 = scalar_select %p1023_p11, 1, 0 }
  0x19   : > { %s1279_s0 = sld [smem:[#allocation15_spill]]  ;;  %s137_s3 = scalar_lea.vmem [#allocation6], %s653_s26 }
  0x1a   : > { %s145_s4 = sshll.u32 %s137_s3, 4  ;;  %p1043_p0 = pnand %p723_p13, %p1006_p4  ;;  %s1039_s4 = int_to_ptr.vmem [resolvable:$true] %s145_s4 }
  0x1b   : > { %s134_s6 = scalar_lea.sflag [#allocation7], %s1030_s25 }
  0x1c   : > { %p798_p3 = pneg %p1043_p0 }
  0x1f   : > { %s1037_s30 = scalar_lea.hbm %s1279_s0, %s671_s27  ;;  %s801_s16 = scalar_lea.hbm %s1279_s0, 256 }
  0x20   : > { %s796_s7 = scalar_lea.hbm %s1037_s30, 128  ;;  %p802_p4 = scmp.lt.u32.totalorder %s1037_s30, %s1279_s0 }
  0x21   : > { %p797_p2 = scmp.ne.s32.totalorder %s1037_s30, %s796_s7  ;;  %p803_p7 = scmp.lt.u32.totalorder %s801_s16, %s796_s7 }
  0x22   : > { %p805_p13 = scmp.lt.u32.totalorder %s796_s7, %s1037_s30 }
  0x23   : > { %p799_p5 = pnand %p798_p3, %p797_p2  ;;  %p804_p10 = por %p803_p7, %p802_p4 }
  0x25   : > { %p800_p6 = pneg %p799_p5  ;;  %p806_p12 = por %p805_p13, %p804_p10 }
  0x27   : > { %p807_p1 = pnand %p806_p12, %p800_p6 }
  0x29   : > { %810 = shalt.err (!%p807_p1)
}
  0x2a   : > { %s811_s20 = scalar_lea.vmem %s1039_s4, 128  ;;  %s944_s26 = smov [#allocation6]  }
  0x2b   : > { %p812_p2 = scmp.ne.s32.totalorder %s1039_s4, %s811_s20  ;;  %s816_s27 = sshll.u32 %s944_s26, 4  ;;  %s817_s27 = int_to_ptr.vmem [resolvable:$false] %s816_s27 }
  0x2c   : > { %s818_s28 = scalar_lea.vmem %s817_s27, 256  ;;  %p819_p9 = scmp.lt.s32.totalorder %s1039_s4, %s817_s27 }
  0x2d   : > { %p814_p5 = pnand %p812_p2, %p798_p3  ;;  %p820_p4 = scmp.lt.s32.totalorder %s818_s28, %s811_s20 }
  0x2f   : > { %p815_p11 = pneg %p814_p5  ;;  %p821_p7 = por %p820_p4, %p819_p9 }
  0x31   : > { %p822_p10 = pnand %p821_p7, %p815_p11 }
  0x33   : > { %825 = shalt.err (!%p822_p10)
}
  0x34   : > { %s945_s29 = smov 32   ;;  %s946_s3 = smov 2  }
  0x35   : > { %715 = dma.hbm_to_vmem [thread:$0]  (!%p1043_p0), %s1037_s30, 128, %s1039_s4, %s134_s6, %s945_s29, %s945_s29, %s946_s3  }
  0x36   : > { %p172_p12 = scmp.lt.s32.totalorder %s942_s14, 3  ;;  %s656_s7 = sshll.u32 %s1030_s25, 1 }
  0x37   : > { %s657_s8 = sshll.u32 %s938_s13, 5  ;;  %p1281_p9 = scmp.ge.s32.totalorder %s942_s14, 1 }
  0x38   : > { %s1088_s19 = scalar_lea.hbm %s1270_s1, %s657_s8  ;;  %s159_s20 = scalar_lea.vmem [#allocation9], %s656_s7 }
  0x39   : > { %p1081_p11 = pnand %p1281_p9, %p172_p12  ;;  %s167_s26 = sshll.u32 %s159_s20, 4  ;;  %s168_s26 = int_to_ptr.vmem [resolvable:$true] %s167_s26 }
  0x3a   : > { %s156_s30 = scalar_lea.sflag [#allocation10], %s1030_s25  ;;  %s826_s4 = scalar_lea.hbm %s1088_s19, 32 }
  0x3b   : > { %s1282_s15 = scalar_select %p1081_p11, 1, 0 }
  0x3c   : > { %p827_p1 = scmp.ne.s32.totalorder %s1088_s19, %s826_s4  ;;  %s831_s28 = scalar_lea.hbm %s1270_s1, 64 }
  0x3d   : > { %p832_p2 = scmp.lt.u32.totalorder %s1088_s19, %s1270_s1  ;;  %p833_p5 = scmp.lt.u32.totalorder %s831_s28, %s826_s4 }
  0x3e   : > { %p829_p6 = pnand %p827_p1, %p798_p3  ;;  %p835_p7 = scmp.lt.u32.totalorder %s826_s4, %s1088_s19 }
  0x3f   : > { %p834_p4 = por %p833_p5, %p832_p2 }
  0x40   : > { %p830_p13 = pneg %p829_p6 }
  0x41   : > { %p836_p10 = por %p835_p7, %p834_p4 }
  0x43   : > { %p837_p12 = pnand %p836_p10, %p830_p13 }
  0x45   : > { %840 = shalt.err (!%p837_p12)
}
  0x46   : > { %s841_s25 = scalar_lea.vmem %s168_s26, 32  ;;  %s947_s7 = smov [#allocation9]  }
  0x47   : > { %p842_p9 = scmp.ne.s32.totalorder %s168_s26, %s841_s25  ;;  %s846_s8 = sshll.u32 %s947_s7, 4  ;;  %s847_s8 = int_to_ptr.vmem [resolvable:$false] %s846_s8 }
  0x48   : > { %s848_s16 = scalar_lea.vmem %s847_s8, 64  ;;  %p849_p8 = scmp.lt.s32.totalorder %s168_s26, %s847_s8 }
  0x49   : > { %p844_p1 = pnand %p842_p9, %p798_p3  ;;  %p850_p11 = scmp.lt.s32.totalorder %s848_s16, %s841_s25 }
  0x4b   : > { %p845_p6 = pneg %p844_p1  ;;  %p851_p2 = por %p850_p11, %p849_p8 }
  0x4d   : > { %p852_p5 = pnand %p851_p2, %p845_p6 }
  0x4f   : > { %855 = shalt.err (!%p852_p5)
}
  0x50   : > { %718 = dma.hbm_to_vmem [thread:$0]  (!%p1043_p0), %s1088_s19, 32, %s168_s26, %s156_s30  }
  0x51   : > { %p1283_p13 = scmp.ne.s32.totalorder %s1282_s15, 0 }
  0x52   : > { %s1113_s18 = sand.u32 (!%p1283_p13), 1, %s926_s10   ;;  %p1284_p3 = scmp.ne.s32.totalorder (!%p1283_p13), %s1276_s21, 0 }
  0x53   : > { %176 = sbr.rel (%p1283_p13) target bundleno = 657 (0x291), region = 28  ;;  %s659_s20 = sshll.u32 (!%p1283_p13), %s1113_s18, 3 }
  0x54   : > { %s179_s4 = scalar_lea.sflag (!%p1283_p13), [#allocation7], %s1113_s18  ;;  %s182_s6 = scalar_lea.vmem (!%p1283_p13), [#allocation6], %s659_s20 }
  0x5a   : > { %909 = dma.done.wait (%p1284_p3), %s179_s4, 128  }
  0x5b   : > { %911 = vsyncadd (%p1284_p3), %s179_s4, 4294967168  ;;  %s660_s5 = sshll.u32 %s1113_s18, 1  ;;  %s188_s15 = scalar_lea.sflag [#allocation10], %s1113_s18 }
  0x5c   : > { %s191_s19 = scalar_lea.vmem [#allocation9], %s660_s5 }
  0x5d   : > { %913 = dma.done.wait (%p1284_p3), %s188_s15, 32  }
  0x5e   : > { %915 = vsyncadd (%p1284_p3), %s188_s15, 4294967264  ;;  %v948_v0 = vmov 0.0   ;;  %v234_v1 = vld [vmem:[%s182_s6] sm:$0x3]  ;;  %v661_v2 = vld [vmem:[%s182_s6 + $0x2] sm:$0x3] }
  0x5f   : > { %228 = vst [vmem:[#allocation4] sm:$0x3] %v948_v0  ;;  %220 = vst [vmem:[#allocation2] sm:$0x3] %v948_v0  ;;  %v662_v3 = vld [vmem:[%s182_s6 + $0x4] sm:$0x3]  ;;  %v241_v4 = vmax.f32 %v234_v1, %v661_v2 }
  0x60   : > { %221 = vst [vmem:[#allocation2 + $0x2] sm:$0x3] %v948_v0  ;;  %222 = vst [vmem:[#allocation2 + $0x4] sm:$0x3] %v948_v0  ;;  %v1140_v5 = vld [vmem:[%s191_s19] sm:$0x3] }
  0x61   : > { %223 = vst [vmem:[#allocation2 + $0x6] sm:$0x3] %v948_v0  ;;  %224 = vst [vmem:[#allocation3] sm:$0x3] %v948_v0  ;;  %v1142_v6 = vld [vmem:[%s182_s6 + $0x6] sm:$0x3]  ;;  %v242_v8 = vmax.f32 %v241_v4, %v662_v3 }
  0x62   : > { %225 = vst [vmem:[#allocation3 + $0x2] sm:$0x3] %v948_v0  ;;  %226 = vst [vmem:[#allocation3 + $0x4] sm:$0x3] %v948_v0  ;;  %vm244_vm0 = vcmp.eq.s32.totalorder %v1140_v5, 0  ;;  %vm252_vm1 = vcmp.eq.s32.totalorder %v1140_v5, 1 }
  0x63   : > { %227 = vst [vmem:[#allocation3 + $0x6] sm:$0x3] %v948_v0  ;;  %229 = vst [vmem:[#allocation4 + $0x2] sm:$0x3] %v948_v0  ;;  %v664_v9 = vsel %vm244_vm0, 1.0, %v948_v0  ;;  %v665_v10 = vsel %vm252_vm1, 1.0, %v948_v0  ;;  %v1154_v15 = vmax.f32 %v242_v8, %v1142_v6 }
  0x64   : > { %230 = vst [vmem:[#allocation4 + $0x4] sm:$0x3] %v948_v0  ;;  %231 = vst [vmem:[#allocation4 + $0x6] sm:$0x3] %v948_v0  ;;  %v1148_v11 = vmul.f32 %v664_v9, %v234_v1  ;;  %v1150_v13 = vmul.f32 %v665_v10, %v661_v2  ;;  %vm260_vm2 = vcmp.eq.s32.totalorder %v1140_v5, 2  ;;  %vm344_vm3 = vcmask 1041408  }
  0x65   : > { %232 = vst [vmem:[#allocation5] sm:$0x3] %v948_v0  ;;  %v666_v17 = vsel %vm260_vm2, 1.0, %v948_v0  ;;  %v249_v21 = vsub.f32 %v234_v1, %v1154_v15  ;;  %v257_v22 = vsub.f32 %v661_v2, %v1154_v15  ;;  %v265_v23 = vsub.f32 %v662_v3, %v1154_v15  ;;  %p1285_p0 = scmp.ne.s32.totalorder %s1277_s22, 0 }
  0x66   : > { %v1157_v19 = vmul.f32 %v666_v17, %v662_v3  ;;  %v273_v24 = vsub.f32 %v1142_v6, %v1154_v15  ;;  %v288_v37 = vld [vmem:[#allocation4] sm:$0x3]  ;;  %v281_v43 = vld [vmem:[#allocation2] sm:$0x3]  ;;  %vm268_vm4 = vcmp.eq.s32.totalorder %v1140_v5, 3 }
  0x67   : > { %v250_v25 = vmul.f32 1.442695, %v249_v21  ;;  %v258_v26 = vmul.f32 1.442695, %v257_v22  ;;  %v266_v27 = vmul.f32 1.442695, %v265_v23 }
  0x68   : > { %v285_v7 = vld [vmem:[#allocation3] sm:$0x3]  ;;  %v274_v28 = vmul.f32 1.442695, %v273_v24  ;;  %v293_v44 = vld [vmem:[#allocation2 + $0x2] sm:$0x3] }
  0x69   : > { %v286_v12 = vadd.f32 %v664_v9, %v285_v7  ;;  %v298_v14 = vld [vmem:[#allocation3 + $0x2] sm:$0x3]  ;;  %v312_v18 = vld [vmem:[#allocation3 + $0x4] sm:$0x3]  ;;  %776 = vpow2.f32 %v250_v25  ;;  %v307_v49 = vld [vmem:[#allocation2 + $0x4] sm:$0x3] }
  0x6a   : > { %v299_v16 = vadd.f32 %v665_v10, %v298_v14  ;;  %v313_v20 = vadd.f32 %v666_v17, %v312_v18  ;;  %778 = vpow2.f32 %v258_v26  ;;  %v302_v38 = vld [vmem:[#allocation4 + $0x2] sm:$0x3]  ;;  %v321_v18 = vld [vmem:[#allocation2 + $0x6] sm:$0x3] }
  0x6b   : > { %287 = vst [vmem:[#allocation3] sm:$0x3] %v286_v12  ;;  %780 = vpow2.f32 %v266_v27  ;;  %v316_v42 = vld [vmem:[#allocation4 + $0x4] sm:$0x3] }
  0x6c   : > { %300 = vst [vmem:[#allocation3 + $0x2] sm:$0x3] %v299_v16  ;;  %314 = vst [vmem:[#allocation3 + $0x4] sm:$0x3] %v313_v20  ;;  %782 = vpow2.f32 %v274_v28  ;;  %v330_v16 = vld [vmem:[#allocation4 + $0x6] sm:$0x3] }
  0x6d   : > { %v326_v20 = vld [vmem:[#allocation3 + $0x6] sm:$0x3] }
  0x72   : > { %v355_v58 = vld [vmem:[#allocation3] sm:$0x3] }
  0x73   : > { %v777_v29 = vpop.eup %776  ;;  %v356_v63 = vsel %vm344_vm3, %v355_v58, 0.0  ;;  %v398_v1 = vld [vmem:[#allocation3 + $0x2] sm:$0x3]  ;;  %v441_v3 = vld [vmem:[#allocation3 + $0x4] sm:$0x3] }
  0x74   : > { %v779_v30 = vpop.eup %778  ;;  %v399_v4 = vsel %vm344_vm3, %v398_v1, 0.0  ;;  %v442_v8 = vsel %vm344_vm3, %v441_v3, 0.0 }
  0x75   : > { %v781_v31 = vpop.eup %780  ;;  %v276_v32 = vadd.f32 %v779_v30, %v777_v29 }
  0x76   : > { %v783_v33 = vpop.eup %782 }
  0x77   : > { %v277_v34 = vadd.f32 %v781_v31, %v276_v32 }
  0x79   : > { %v1164_v35 = vadd.f32 %v783_v33, %v277_v34 }
  0x7b   : > { %784 = vrcp.f32 %v1164_v35 }
  0x7c   : > { %786 = vlog2.f32 %v1164_v35 }
  0x85   : > { %v785_v36 = vpop.eup %784 }
  0x86   : > { %v280_v39 = vmul.f32 %v785_v36, %v777_v29  ;;  %v291_v40 = vmul.f32 %v785_v36, %v779_v30  ;;  %v305_v41 = vmul.f32 %v785_v36, %v781_v31  ;;  %v319_v14 = vmul.f32 %v785_v36, %v783_v33  ;;  %v787_v32 = vpop.eup %786 }
  0x87   : > { %v256_v29 = vadd.f32 %v1150_v13, %v1148_v11  ;;  %v334_v34 = vmul.f32 0.6931472, %v787_v32 }
  0x88   : > { %v289_v45 = vadd.f32 %v288_v37, %v280_v39  ;;  %v282_v46 = vmul.f32 %v664_v9, %v280_v39  ;;  %v294_v47 = vmul.f32 %v665_v10, %v291_v40  ;;  %v303_v48 = vadd.f32 %v302_v38, %v291_v40  ;;  %v336_v37 = vld [vmem:[#allocation5] sm:$0x3] }
  0x89   : > { %v308_v50 = vmul.f32 %v666_v17, %v305_v41  ;;  %v317_v51 = vadd.f32 %v316_v42, %v305_v41  ;;  %v667_v17 = vsel %vm268_vm4, 1.0, %v948_v0  ;;  %v331_v22 = vadd.f32 %v330_v16, %v319_v14 }
  0x8a   : > { %290 = vst [vmem:[#allocation4] sm:$0x3] %v289_v45  ;;  %v283_v52 = vadd.f32 %v282_v46, %v281_v43  ;;  %v295_v53 = vadd.f32 %v294_v47, %v293_v44  ;;  %304 = vst [vmem:[#allocation4 + $0x2] sm:$0x3] %v303_v48  ;;  %v322_v21 = vmul.f32 %v667_v17, %v319_v14 }
  0x8b   : > { %v309_v54 = vadd.f32 %v308_v50, %v307_v49  ;;  %318 = vst [vmem:[#allocation4 + $0x4] sm:$0x3] %v317_v51  ;;  %v327_v23 = vadd.f32 %v667_v17, %v326_v20  ;;  %332 = vst [vmem:[#allocation4 + $0x6] sm:$0x3] %v331_v22  ;;  %v264_v30 = vadd.f32 %v1157_v19, %v256_v29 }
  0x8c   : > { %284 = vst [vmem:[#allocation2] sm:$0x3] %v283_v52  ;;  %296 = vst [vmem:[#allocation2 + $0x2] sm:$0x3] %v295_v53  ;;  %v323_v24 = vadd.f32 %v322_v21, %v321_v18  ;;  %v271_v31 = vmul.f32 %v667_v17, %v1142_v6  ;;  %v335_v36 = vadd.f32 %v334_v34, %v1154_v15 }
  0x8d   : > { %310 = vst [vmem:[#allocation2 + $0x4] sm:$0x3] %v309_v54  ;;  %328 = vst [vmem:[#allocation3 + $0x6] sm:$0x3] %v327_v23 }
  0x8e   : > { %324 = vst [vmem:[#allocation2 + $0x6] sm:$0x3] %v323_v24  ;;  %v272_v33 = vadd.f32 %v271_v31, %v264_v30 }
  0x90   : > { %v337_v38 = vsub.f32 %v335_v36, %v272_v33 }
  0x91   : > { %v366_v55 = vld [vmem:[#allocation4] sm:$0x3]  ;;  %v409_v62 = vld [vmem:[#allocation4 + $0x2] sm:$0x3] }
  0x92   : > { %v367_v56 = vsel %vm344_vm3, %v366_v55, 0.0  ;;  %v410_v2 = vsel %vm344_vm3, %v409_v62, 0.0  ;;  %v452_v10 = vld [vmem:[#allocation4 + $0x4] sm:$0x3]  ;;  %v495_v28 = vld [vmem:[#allocation4 + $0x6] sm:$0x3]  ;;  %v338_v39 = vadd.f32 %v337_v38, %v336_v37 }
  0x93   : > { %368 = vadd.xlane.f32.xlu1 %v367_v56  ;;  %v343_v57 = vld [vmem:[#allocation2] sm:$0x3]  ;;  %v387_v59 = vld [vmem:[#allocation2 + $0x2] sm:$0x3]  ;;  %v453_v12 = vsel %vm344_vm3, %v452_v10, 0.0  ;;  %v496_v0 = vsel %vm344_vm3, %v495_v28, 0.0 }
  0x94   : > { %v345_v60 = vsel %vm344_vm3, %v343_v57, 0.0  ;;  %v388_v61 = vsel %vm344_vm3, %v387_v59, 0.0  ;;  %v430_v7 = vld [vmem:[#allocation2 + $0x4] sm:$0x3]  ;;  %v484_v25 = vld [vmem:[#allocation3 + $0x6] sm:$0x3] }
  0x95   : > { %346 = vadd.xlane.f32.xlu0 %v345_v60  ;;  %v431_v9 = vsel %vm344_vm3, %v430_v7, 0.0  ;;  %v485_v26 = vsel %vm344_vm3, %v484_v25, 0.0  ;;  %v473_v27 = vld [vmem:[#allocation2 + $0x6] sm:$0x3]  ;;  %339 = vst [vmem:[#allocation5] sm:$0x3] %v338_v39 }
  0x96   : > { %v474_v5 = vsel %vm344_vm3, %v473_v27, 0.0 }
  0x97   : > { %389 = vadd.xlane.f32.xlu1 %v388_v61 }
  0x99   : > { %357 = vadd.xlane.f32.xlu0 %v356_v63 }
  0x9b   : > { %411 = vadd.xlane.f32.xlu1 %v410_v2 }
  0x9c   : > { %v516_v40 = vld [vmem:[#allocation5] sm:$0x3] }
  0x9d   : > { %400 = vadd.xlane.f32.xlu0 %v399_v4  ;;  %v517_v41 = vsel %vm344_vm3, %v516_v40, 0.0 }
  0x9f   : > { %443 = vadd.xlane.f32.xlu1 %v442_v8 }
  0xa1   : > { %432 = vadd.xlane.f32.xlu0 %v431_v9 }
  0xa3   : > { %475 = vadd.xlane.f32.xlu1 %v474_v5 }
  0xa5   : > { %454 = vadd.xlane.f32.xlu0 %v453_v12 }
  0xa7   : > { %497 = vadd.xlane.f32.xlu1 %v496_v0 }
  0xa9   : > { %486 = vadd.xlane.f32.xlu0 %v485_v26 }
  0xad   : > { %518 = vadd.xlane.f32.xlu0 %v517_v41 }
 0x120   : > { %v369_v11 = vpop.xlane.xlu1 %368 }
 0x121   : > { %v370_v13 = vrot.slane %v369_v11, 4 }
 0x122   : > { %v347_v35 = vpop.xlane.xlu0 %346 }
 0x123   : > { %v371_v42 = vadd.f32 %v370_v13, %v369_v11  ;;  %v348_v19 = vrot.slane %v347_v35, 4 }
 0x124   : > { %v390_v57 = vpop.xlane.xlu1 %389 }
 0x125   : > { %v349_v43 = vadd.f32 %v348_v19, %v347_v35  ;;  %v372_v6 = vrot.slane %v371_v42, 2  ;;  %v391_v60 = vrot.slane %v390_v57, 4 }
 0x126   : > { %v358_v44 = vpop.xlane.xlu0 %357 }
 0x127   : > { %v350_v45 = vrot.slane %v349_v43, 2  ;;  %v359_v46 = vrot.slane %v358_v44, 4  ;;  %v373_v48 = vadd.f32 %v372_v6, %v371_v42  ;;  %v392_v63 = vadd.f32 %v391_v60, %v390_v57 }
 0x128   : > { %v412_v59 = vpop.xlane.xlu1 %411 }
 0x129   : > { %v360_v47 = vadd.f32 %v359_v46, %v358_v44  ;;  %v351_v15 = vadd.f32 %v350_v45, %v349_v43  ;;  %v374_v53 = vrot.slane %v373_v48, 1  ;;  %v413_v62 = vrot.slane %v412_v59, 4 }
 0x12a   : > { %v401_v58 = vpop.xlane.xlu0 %400  ;;  %v393_v3 = vrot.slane %v392_v63, 2 }
 0x12b   : > { %v361_v49 = vrot.slane %v360_v47, 2  ;;  %v352_v50 = vrot.slane %v351_v15, 1  ;;  %v375_v56 = vadd.f32 %v374_v53, %v373_v48  ;;  %v402_v61 = vrot.slane %v401_v58, 4 }
 0x12c   : > { %v414_v2 = vadd.f32 %v413_v62, %v412_v59  ;;  %v394_v9 = vadd.f32 %v393_v3, %v392_v63  ;;  %v444_v24 = vpop.xlane.xlu1 %443 }
 0x12d   : > { %v353_v51 = vadd.f32 %v352_v50, %v351_v15  ;;  %v362_v52 = vadd.f32 %v361_v49, %v360_v47  ;;  %v403_v1 = vadd.f32 %v402_v61, %v401_v58  ;;  %v445_v27 = vrot.slane %v444_v24, 4 }
 0x12e   : > { %v415_v8 = vrot.slane %v414_v2, 2  ;;  %v395_v14 = vrot.slane %v394_v9, 1  ;;  %v433_v23 = vpop.xlane.xlu0 %432 }
 0x12f   : > { %672 = vpush %v353_v51  ;;  %v363_v54 = vrot.slane %v362_v52, 1  ;;  %v404_v4 = vrot.slane %v403_v1, 2  ;;  %v434_v26 = vrot.slane %v433_v23, 4  ;;  %v446_v0 = vadd.f32 %v445_v27, %v444_v24 }
 0x130   : > { %v416_v12 = vadd.f32 %v415_v8, %v414_v2  ;;  %v396_v20 = vadd.f32 %v395_v14, %v394_v9  ;;  %v476_v42 = vpop.xlane.xlu1 %475 }
 0x131   : > { %v364_v55 = vadd.f32 %v363_v54, %v362_v52  ;;  %v405_v10 = vadd.f32 %v404_v4, %v403_v1  ;;  %v435_v5 = vadd.f32 %v434_v26, %v433_v23  ;;  %v447_v31 = vrot.slane %v446_v0, 2 }
 0x132   : > { %v417_v17 = vrot.slane %v416_v12, 1  ;;  %v455_v25 = vpop.xlane.xlu0 %454  ;;  %v477_v6 = vrot.slane %v476_v42, 4 }
 0x133   : > { %674 = vpush %v364_v55  ;;  %v406_v16 = vrot.slane %v405_v10, 1  ;;  %v456_v28 = vrot.slane %v455_v25, 4  ;;  %v436_v30 = vrot.slane %v435_v5, 2  ;;  %v448_v36 = vadd.f32 %v447_v31, %v446_v0 }
 0x134   : > { %676 = vpush %v375_v56  ;;  %v418_v22 = vadd.f32 %v417_v17, %v416_v12  ;;  %v498_v43 = vpop.xlane.xlu1 %497  ;;  %v478_v46 = vadd.f32 %v477_v6, %v476_v42 }
 0x135   : > { %v407_v21 = vadd.f32 %v406_v16, %v405_v10  ;;  %v457_v29 = vadd.f32 %v456_v28, %v455_v25  ;;  %v437_v34 = vadd.f32 %v436_v30, %v435_v5  ;;  %v449_v39 = vrot.slane %v448_v36, 1 }
 0x136   : > { %v487_v19 = vpop.xlane.xlu0 %486  ;;  %v499_v45 = vrot.slane %v498_v43, 4  ;;  %v479_v48 = vrot.slane %v478_v46, 2 }
 0x137   : > { %v458_v33 = vrot.slane %v457_v29, 2  ;;  %v438_v38 = vrot.slane %v437_v34, 1  ;;  %v450_v13 = vadd.f32 %v449_v39, %v448_v36  ;;  %v488_v44 = vrot.slane %v487_v19, 4 }
 0x138   : > { %v500_v15 = vadd.f32 %v499_v45, %v498_v43  ;;  %v480_v52 = vadd.f32 %v479_v48, %v478_v46 }
 0x139   : > { %v459_v37 = vadd.f32 %v458_v33, %v457_v29  ;;  %v439_v11 = vadd.f32 %v438_v38, %v437_v34  ;;  %v489_v47 = vadd.f32 %v488_v44, %v487_v19 }
 0x13a   : > { %v501_v51 = vrot.slane %v500_v15, 2  ;;  %v481_v55 = vrot.slane %v480_v52, 1  ;;  %v519_v62 = vpop.xlane.xlu0 %518 }
 0x13b   : > { %v460_v40 = vrot.slane %v459_v37, 1  ;;  %v490_v49 = vrot.slane %v489_v47, 2  ;;  %v520_v63 = vrot.slane %v519_v62, 4 }
 0x13c   : > { %v502_v54 = vadd.f32 %v501_v51, %v500_v15  ;;  %v482_v59 = vadd.f32 %v481_v55, %v480_v52 }
 0x13d   : > { %v461_v35 = vadd.f32 %v460_v40, %v459_v37  ;;  %v491_v53 = vadd.f32 %v490_v49, %v489_v47  ;;  %v521_v1 = vadd.f32 %v520_v63, %v519_v62 }
 0x13e   : > { %v503_v57 = vrot.slane %v502_v54, 1 }
 0x13f   : > { %v492_v56 = vrot.slane %v491_v53, 1  ;;  %v522_v2 = vrot.slane %v521_v1, 2 }
 0x140   : > { %v504_v61 = vadd.f32 %v503_v57, %v502_v54 }
 0x141   : > { %v493_v60 = vadd.f32 %v492_v56, %v491_v53  ;;  %v523_v4 = vadd.f32 %v522_v2, %v521_v1 }
 0x160   : > { %s1188_s21 = spop %672 }
 0x161   : > { %s377_s29 = smul.f32 2.0, %s1188_s21 }
 0x163   : > { %s1191_s3 = sadd.f32 1e-05, %s377_s29 }
 0x164   : > { %s675_s26 = spop %674 }
 0x165   : > { %s677_s30 = spop %676 }
 0x166   : > { %s379_s27 = sadd.f32 %s677_s30, %s675_s26 }
 0x168   : > { %s380_s28 = sadd.f32 1e-05, %s379_s27 }
 0x16a   : > { %v381_v7 = vstv %s380_s28 }
 0x16b   : > { %788 = vrcp.f32 %v381_v7  ;;  %v524_v7 = vrot.slane %v523_v4, 1 }
 0x16d   : > { %v525_v8 = vadd.f32 %v524_v7, %v523_v4 }
 0x175   : > { %v789_v18 = vpop.eup %788 }
 0x176   : > { %678 = vpush %v789_v18 }
 0x177   : > { %680 = vpush %v396_v20 }
 0x178   : > { %682 = vpush %v407_v21 }
 0x179   : > { %684 = vpush %v418_v22 }
 0x1a7   : > { %s1193_s25 = spop %678 }
 0x1a8   : > { %s384_s7 = smul.f32 %s1193_s25, %s1191_s3  ;;  %s1197_s8 = spop %680 }
 0x1a9   : > { %s683_s16 = spop %682  ;;  %s420_s5 = smul.f32 2.0, %s1197_s8 }
 0x1aa   : > { %s685_s20 = spop %684  ;;  %s1205_s30 = ssub.f32 1.0, %s384_s7 }
 0x1ab   : > { %s422_s4 = sadd.f32 %s685_s20, %s683_s16 }
 0x1ac   : > { %s421_s15 = sadd.f32 1e-05, %s420_s5 }
 0x1ad   : > { %s423_s6 = sadd.f32 1e-05, %s422_s4 }
 0x1af   : > { %v424_v32 = vstv %s423_s6 }
 0x1b0   : > { %790 = vrcp.f32 %v424_v32 }
 0x1ba   : > { %v791_v41 = vpop.eup %790 }
 0x1bb   : > { %686 = vpush %v791_v41 }
 0x1bc   : > { %688 = vpush %v439_v11 }
 0x1bd   : > { %690 = vpush %v450_v13 }
 0x1be   : > { %692 = vpush %v461_v35 }
 0x1ec   : > { %s687_s19 = spop %686 }
 0x1ed   : > { %s427_s21 = smul.f32 %s687_s19, %s421_s15  ;;  %s1200_s26 = spop %688 }
 0x1ee   : > { %s691_s27 = spop %690  ;;  %s463_s3 = smul.f32 2.0, %s1200_s26 }
 0x1ef   : > { %s1207_s28 = ssub.f32 1.0, %s427_s21  ;;  %s693_s29 = spop %692 }
 0x1f0   : > { %s465_s16 = sadd.f32 %s693_s29, %s691_s27 }
 0x1f1   : > { %s429_s8 = sadd.f32 %s1207_s28, %s1205_s30 }
 0x1f2   : > { %s466_s20 = sadd.f32 1e-05, %s465_s16 }
 0x1f3   : > { %s464_s25 = sadd.f32 1e-05, %s463_s3 }
 0x1f4   : > { %v467_v50 = vstv %s466_s20 }
 0x1f5   : > { %792 = vrcp.f32 %v467_v50 }
 0x1ff   : > { %v793_v58 = vpop.eup %792 }
 0x200   : > { %694 = vpush %v793_v58 }
 0x201   : > { %696 = vpush %v482_v59 }
 0x202   : > { %698 = vpush %v493_v60 }
 0x203   : > { %700 = vpush %v504_v61 }
 0x231   : > { %s695_s7 = spop %694 }
 0x232   : > { %s470_s4 = smul.f32 %s695_s7, %s464_s25  ;;  %s697_s6 = spop %696 }
 0x233   : > { %s699_s5 = spop %698  ;;  %s506_s26 = smul.f32 2.0, %s697_s6 }
 0x234   : > { %s471_s15 = ssub.f32 1.0, %s470_s4  ;;  %s701_s19 = spop %700 }
 0x235   : > { %s508_s27 = sadd.f32 %s701_s19, %s699_s5  ;;  %s668_s7 = sshll.u32 %s934_s12, 4 }
 0x236   : > { %s472_s21 = sadd.f32 %s471_s15, %s429_s8  ;;  %s215_s5 = scalar_lea.vmem [#allocation11], %s1113_s18 }
 0x237   : > { %s509_s29 = sadd.f32 1e-05, %s508_s27  ;;  %s549_s15 = sshll.u32 %s215_s5, 4  ;;  %s1222_s15 = int_to_ptr.vmem [resolvable:$true] %s549_s15 }
 0x238   : > { %s507_s16 = sadd.f32 1e-05, %s506_s26  ;;  %s1220_s0 = scalar_lea.hbm %s1271_s2, %s668_s7 }
 0x239   : > { %v510_v3 = vstv %s509_s29  ;;  %s537_s6 = scalar_lea.sflag [#allocation8], %s1113_s18  ;;  %s949_s12 = smov [#allocation11]  }
 0x23a   : > { %794 = vrcp.f32 %v510_v3  ;;  %s860_s26 = sshll.u32 %s949_s12, 4  ;;  %s861_s26 = int_to_ptr.vmem [resolvable:$false] %s860_s26 }
 0x23b   : > { %p863_p7 = scmp.lt.s32.totalorder %s1222_s15, %s861_s26 }
 0x244   : > { %v795_v9 = vpop.eup %794 }
 0x245   : > { %702 = vpush %v795_v9 }
 0x246   : > { %704 = vpush %v525_v8 }
 0x276   : > { %s703_s20 = spop %702 }
 0x277   : > { %s513_s3 = smul.f32 %s703_s20, %s507_s16  ;;  %s705_s28 = spop %704 }
 0x278   : > { %s532_s25 = smul.f32 0.001953125, %s705_s28  ;;  %s862_s16 = scalar_lea.vmem %s861_s26, 32 }
 0x279   : > { %s514_s30 = ssub.f32 1.0, %s513_s3 }
 0x27b   : > { %s515_s8 = sadd.f32 %s514_s30, %s472_s21  ;;  %s856_s21 = scalar_lea.vmem %s1222_s15, 16 }
 0x27c   : > { %p857_p8 = scmp.ne.s32.totalorder %s1222_s15, %s856_s21  ;;  %p864_p10 = scmp.lt.s32.totalorder %s862_s16, %s856_s21 }
 0x27d   : > { %s529_s4 = smul.f32 0.125, %s515_s8 }
 0x27e   : > { %p858_p11 = pnand %p857_p8, %p1285_p0  ;;  %p865_p12 = por %p864_p10, %p863_p7 }
 0x27f   : > { %s533_s19 = sadd.f32 %s532_s25, %s529_s4 }
 0x280   : > { %p859_p4 = pneg %p858_p11 }
 0x281   : > { %v534_v10 = vstv %s533_s19 }
 0x282   : > { %535 = vst [vmem:[%s215_s5] sm:$0x1] %v534_v10  ;;  %p866_p9 = pnand %p865_p12, %p859_p4 }
 0x284   : > { %869 = shalt.err (!%p866_p9)
}
 0x285   : > { %s870_s18 = scalar_lea.hbm %s1220_s0, 16  ;;  %s874_s30 = scalar_lea.hbm %s1271_s2, 32 }
 0x286   : > { %p871_p1 = scmp.ne.s32.totalorder %s1220_s0, %s870_s18  ;;  %p875_p5 = scmp.lt.u32.totalorder %s1220_s0, %s1271_s2 }
 0x287   : > { %p876_p13 = scmp.lt.u32.totalorder %s874_s30, %s870_s18  ;;  %p878_p8 = scmp.lt.u32.totalorder %s870_s18, %s1220_s0 }
 0x288   : > { %p872_p6 = pnand %p871_p1, %p1285_p0 }
 0x289   : > { %p877_p3 = por %p876_p13, %p875_p5 }
 0x28a   : > { %p873_p2 = pneg %p872_p6 }
 0x28b   : > { %p879_p11 = por %p878_p8, %p877_p3 }
 0x28d   : > { %p880_p4 = pnand %p879_p11, %p873_p2 }
 0x28f   : > { %883 = shalt.err (!%p880_p4)
}
 0x290   : > { %710 = dma.vmem_to_hbm [thread:$0]  (%p1285_p0), %s1222_s15, 16, %s1220_s0, %s537_s6  }
 0x291 PF: > { %s561_s25 = sand.u32 1, %s922_s9   ;;  %p1286_p7 = scmp.ne.s32.totalorder %s1278_s24, 0 }
 0x292   : > { %p1287_p10 = scmp.ge.s32.totalorder %s942_s14, 2  ;;  %s562_s7 = scalar_lea.sflag [#allocation8], %s561_s25 }
 0x294   : > { %p720_p12 = pnand %p1287_p10, %p1286_p7 }
 0x296   : > { %917 = dma.done.wait (!%p720_p12), %s562_s7, 16  }
 0x297   : > { %919 = vsyncadd (!%p720_p12), %s562_s7, 4294967280  ;;  %s21_s14 = sadd.s32 1, %s942_s14   ;;  %s1288_s9 = smov %s926_s10 }
 0x298   : > { %p18_p9 = scmp.ge.s32.totalorder %s21_s14, 4   ;;  %s1289_s10 = smov %s930_s11 }
 0x299   : > { %s1290_s11 = smov %s1021_s23  ;;  %s1291_s12 = smov %s938_s13 }
 0x29a   : > { %s1292_s13 = smov %s1294_s17  ;;  %20 = sbr.rel (!%p18_p9) target bundleno = 10 (0xa), region = 106 }
 0x2a1   :  { %566 = vsyncpa [#allocation7], 1 }
 0x2a2   :  { %568 = vsyncpa [#allocation7 + $0x1], 1 }
 0x2a3   :  { %569 = vsyncpa [#allocation10], 1 }
 0x2a4   :  { %571 = vsyncpa [#allocation10 + $0x1], 1 }
 0x2a5   :  { %572 = vsyncpa [#allocation8], 1 }
 0x2a6   :  { %574 = vsyncpa [#allocation8 + $0x1], 1 }

</bundles_post_ra>
